<compile_context>
chip_gen: v7x
topology: tpu7x:2x2x1
jax: 0.10.0
libtpu: 0.0.40
codegen_flags: <defaults>
</compile_context>

<pallas_src>
import math

import jax
import jax.numpy as jnp
from jax.experimental import pallas as pl
from jax.experimental.pallas import tpu as pltpu


def _round_up(x, m):
    return ((x + m - 1) // m) * m


def _dense_film_kernel(x_ref, ws_ref, wt_ref, bs_ref, bt_ref,
                       scale_ref, shift_ref):
    # ---- Mish in f32, one transcendental (exp) ----
    x = x_ref[...].astype(jnp.float32)                        # [tm, C]
    t = jnp.exp(jnp.minimum(x, 20.0))                         # EUP
    q = (1.0 + t) * (1.0 + t)                                 # q = exp(2*softplus(x))
    d = q + 1.0
    inv = pl.reciprocal(d, approx=True)                       # EUP slot (cheap)
    inv = inv * (2.0 - d * inv)                               # one Newton step (VPU) -> ~f32 accuracy
    h = jnp.where(x > 20.0, x, x * (q - 1.0) * inv)           # x * tanh(softplus(x))

    # ---- Linear: feed the MXU in the weight's native dtype, accumulate f32 ----
    # TODO(synk): when ncol > 1 Mish is recomputed once per N tile; cache h in a VMEM
    # scratch under @pl.when(j == 0) if profiles ever show EUP/VPU pressure.
    h = h.astype(ws_ref.dtype)
    ys = jnp.dot(h, ws_ref[...], preferred_element_type=jnp.float32)   # [tm, tn]
    yt = jnp.dot(h, wt_ref[...], preferred_element_type=jnp.float32)   # [tm, tn]
    scale_ref[...] = (ys + bs_ref[...].astype(jnp.float32)).astype(scale_ref.dtype)
    shift_ref[...] = (yt + bt_ref[...].astype(jnp.float32)).astype(shift_ref.dtype)


def _vmem_budget():
    """(vmem_limit_bytes, single-buffer tile-set budget) for the current TPU generation."""
    mib = 1024 * 1024
    try:
        cap = int(pltpu.get_tpu_info().vmem_capacity_bytes)
    except Exception:
        cap = 64 * mib                       # conservative default: v7x per-TC VMEM
    vmem_limit = max(32 * mib, min(64 * mib, cap - 16 * mib))   # 64 MiB v5e/v6e, 48 MiB v7x
    budget = vmem_limit // 2 - 4 * mib       # Pallas double-buffers each stream
    return vmem_limit, budget


def _choose_tiles(B, C, x_itemsize, w_itemsize, o_itemsize, budget):
    # N tile: lane-aligned divisor of C (wide tiles keep the weight DMA near HBM roofline).
    tn = next((c for c in (1024, 512, 256, 128) if C % c == 0), C)
    # M tile: sublane-aligned, up to 512 rows.
    tm = min(512, _round_up(max(B, 1), 8))

    def step_bytes(tm_, tn_):
        return (tm_ * C * x_itemsize            # x tile
                + 2 * C * tn_ * w_itemsize      # scale + shift weight tiles
                + 2 * tn_ * w_itemsize          # bias tiles
                + 2 * tm_ * tn_ * o_itemsize)   # scale + shift output tiles

    # Shrink M first (keep tn wide for DMA efficiency), then N, until one buffer-set fits.
    while tm > 128 and step_bytes(tm, tn) > budget:
        tm = max(128, 8 * ((tm // 2) // 8))
    while tn > 128 and C % (tn // 2) == 0 and step_bytes(tm, tn) > budget:
        tn //= 2
    # TODO(synk): for very large C add a K reduction grid axis + f32 VMEM accumulator
    # instead of keeping the full K=C slab resident.
    return tm, tn


def dense_film(position, weight, bias):
    """position: [B, C], weight: [C, 2C], bias: [2C] -> (scale [B,1,C], shift [B,1,C])."""
    B, C = position.shape
    assert weight.shape == (C, 2 * C), weight.shape
    assert C % 128 == 0, "embed_channels must be a multiple of 128 (lane-aligned weight tiles)"
    # TODO(synk): pad C (and both weight halves) up to a multiple of 128 for odd widths.

    x_bytes = jnp.dtype(position.dtype).itemsize
    w_bytes = jnp.dtype(weight.dtype).itemsize
    o_bytes = x_bytes

    vmem_limit, budget = _vmem_budget()
    tm, tn = _choose_tiles(B, C, x_bytes, w_bytes, o_bytes, budget)

    # Tiny/unaligned batches only: pad rows up to one M tile (cheap).  Aligned or large
    # batches run unpadded; Pallas masks the ragged last M block itself.
    x = position
    b_rows = B
    if tm > B:
        b_rows = tm
        x = jnp.pad(position, ((0, tm - B), (0, 0)))
    m_tiles = pl.cdiv(b_rows, tm)

    # v7x: if the grid would collapse to (1, 1) at wide C, split N so the "parallel"
    # N axis can shard across the 2 TensorCores (near-free on v5e/v6e).
    if m_tiles == 1 and tn == C and tn >= 256:
        tn //= 2
    ncol = C // tn

    bias2d = bias.reshape(1, 2 * C)

    # Grid order: M innermost when the weight stream dominates, so the weight/bias
    # block indices stay constant across consecutive steps and their re-DMA is skipped.
    # Otherwise N innermost so the x tile stays resident across the weight sweep.
    m_inner = 2 * C * w_bytes > b_rows * x_bytes
    if m_inner:
        grid = (ncol, m_tiles)
        x_map = lambda j, i: (i, 0)
        ws_map = lambda j, i: (0, j)
        wt_map = lambda j, i: (0, j + ncol)
        bs_map = lambda j, i: (0, j)
        bt_map = lambda j, i: (0, j + ncol)
        out_map = lambda j, i: (i, j)
    else:
        grid = (m_tiles, ncol)
        x_map = lambda i, j: (i, 0)
        ws_map = lambda i, j: (0, j)
        wt_map = lambda i, j: (0, j + ncol)
        bs_map = lambda i, j: (0, j)
        bt_map = lambda i, j: (0, j + ncol)
        out_map = lambda i, j: (i, j)

    weight_reads = 1 if m_inner else m_tiles
    x_reads = ncol if m_inner else 1
    cost = pl.CostEstimate(
        flops=int(2 * b_rows * C * (2 * C) + 12 * b_rows * C),
        transcendentals=int(b_rows * C),
        bytes_accessed=int(b_rows * C * x_bytes * x_reads
                           + (2 * C * C + 2 * C) * w_bytes * weight_reads
                           + 2 * b_rows * C * o_bytes),
    )

    scale_full, shift_full = pl.pallas_call(
        _dense_film_kernel,
        out_shape=(jax.ShapeDtypeStruct((b_rows, C), position.dtype),
                   jax.ShapeDtypeStruct((b_rows, C), position.dtype)),
        grid_spec=pltpu.PrefetchScalarGridSpec(
            num_scalar_prefetch=0,
            grid=grid,
            in_specs=[
                pl.BlockSpec((tm, C), x_map),    # x (activation)
                pl.BlockSpec((C, tn), ws_map),   # W[:, :C]   (scale half)
                pl.BlockSpec((C, tn), wt_map),   # W[:, C:]   (shift half)
                pl.BlockSpec((1, tn), bs_map),   # b[:C]
                pl.BlockSpec((1, tn), bt_map),   # b[C:]
            ],
            out_specs=[
                pl.BlockSpec((tm, tn), out_map),  # scale
                pl.BlockSpec((tm, tn), out_map),  # shift
            ],
        ),
        compiler_params=pltpu.CompilerParams(
            dimension_semantics=("parallel", "parallel"),
            vmem_limit_bytes=int(vmem_limit),
        ),
        cost_estimate=cost,
    )(x, weight, weight, bias2d, bias2d)

    if b_rows != B:          # only for tiny unaligned batches
        scale_full = scale_full[:B]
        shift_full = shift_full[:B]
    # 'b c -> b 1 c' (metadata-only reshape)
    return scale_full[:, None, :], shift_full[:, None, :]


def init_params(key, embed_channels, dtype=jnp.float32):
    """nn.Linear default init (uniform(-1/sqrt(C), 1/sqrt(C))); weight stored [C, 2C]."""
    k_w, k_b = jax.random.split(key)
    bound = 1.0 / math.sqrt(embed_channels)
    weight = jax.random.uniform(
        k_w, (embed_channels, 2 * embed_channels), dtype, -bound, bound)
    bias = jax.random.uniform(k_b, (2 * embed_channels,), dtype, -bound, bound)
    return weight, bias


if __name__ == "__main__":
    B = 8                   # sublane-aligned batch (MXU rows not masked)
    EMBED_CHANNELS = 128    # lane-aligned channel count

    key = jax.random.PRNGKey(0)
    k_pos, k_params = jax.random.split(key)

    position = jax.random.normal(k_pos, (B, EMBED_CHANNELS), jnp.float32)
    weight, bias = init_params(k_params, EMBED_CHANNELS)

    # --- f32 weights ---
    scale, shift = dense_film(position, weight, bias)
    jax.block_until_ready((scale, shift))

    # Pure-JAX reference (standard Mish formulation).
    h_ref = position * jnp.tanh(jax.nn.softplus(position))
    y_ref = jnp.dot(h_ref, weight, precision=jax.lax.Precision.HIGHEST) + bias
    scale_ref = y_ref[:, None, :EMBED_CHANNELS]
    shift_ref = y_ref[:, None, EMBED_CHANNELS:]

    assert scale.shape == (B, 1, EMBED_CHANNELS)
    assert shift.shape == (B, 1, EMBED_CHANNELS)
    assert jnp.allclose(scale, scale_ref, atol=1e-4, rtol=1e-3)
    assert jnp.allclose(shift, shift_ref, atol=1e-4, rtol=1e-3)

    # --- bf16 weights (recommended deployment dtype: halves the dominant HBM stream;
    #     the kernel feeds the MXU in native dtype and accumulates in f32) ---
    scale_bf, shift_bf = dense_film(position,
                                    weight.astype(jnp.bfloat16),
                                    bias.astype(jnp.bfloat16))
    jax.block_until_ready((scale_bf, shift_bf))
    assert jnp.allclose(scale_bf, scale_ref, atol=5e-2, rtol=5e-2)
    assert jnp.allclose(shift_bf, shift_ref, atol=5e-2, rtol=5e-2)

    print("KERNEL_OK")
</pallas_src>

<mosaic_0001>
module attributes {stable_mosaic.version = 11 : i64} {
  func.func @_dense_film_kernel(%arg0: i32, %arg1: i32, %arg2: memref<8x128xf32, #tpu.memory_space<vmem>>, %arg3: memref<128x128xf32, #tpu.memory_space<vmem>>, %arg4: memref<128x128xf32, #tpu.memory_space<vmem>>, %arg5: memref<1x128xf32, #tpu.memory_space<vmem>>, %arg6: memref<1x128xf32, #tpu.memory_space<vmem>>, %arg7: memref<8x128xf32, #tpu.memory_space<vmem>>, %arg8: memref<8x128xf32, #tpu.memory_space<vmem>>) attributes {dimension_semantics = [#tpu.dimension_semantics<parallel>, #tpu.dimension_semantics<parallel>], iteration_bounds = array<i64: 1, 1>, scalar_prefetch = 0 : i64, scratch_operands = 0 : i64, tpu.core_type = #tpu.core_type<tc>, window_params = [{transform_indices = @transform_0, window_bounds = array<i64: 8, 128>}, {transform_indices = @transform_1, window_bounds = array<i64: 128, 128>}, {transform_indices = @transform_2, window_bounds = array<i64: 128, 128>}, {transform_indices = @transform_3, window_bounds = array<i64: 1, 128>}, {transform_indices = @transform_4, window_bounds = array<i64: 1, 128>}, {transform_indices = @transform_5, window_bounds = array<i64: 8, 128>}, {transform_indices = @transform_6, window_bounds = array<i64: 8, 128>}]} {
    %c0 = arith.constant 0 : index
    %c0_0 = arith.constant 0 : index
    %0 = vector.load %arg2[%c0, %c0_0] : memref<8x128xf32, #tpu.memory_space<vmem>>, vector<8x128xf32>
    %cst = arith.constant 2.000000e+01 : f32
    %1 = vector.broadcast %cst : f32 to vector<8x128xf32>
    %2 = arith.minimumf %0, %1 : vector<8x128xf32>
    %3 = math.exp %2 : vector<8x128xf32>
    %cst_1 = arith.constant 1.000000e+00 : f32
    %4 = vector.broadcast %cst_1 : f32 to vector<8x128xf32>
    %5 = arith.addf %4, %3 : vector<8x128xf32>
    %cst_2 = arith.constant 1.000000e+00 : f32
    %6 = vector.broadcast %cst_2 : f32 to vector<8x128xf32>
    %7 = arith.addf %6, %3 : vector<8x128xf32>
    %8 = arith.mulf %5, %7 : vector<8x128xf32>
    %cst_3 = arith.constant 1.000000e+00 : f32
    %9 = vector.broadcast %cst_3 : f32 to vector<8x128xf32>
    %10 = arith.addf %8, %9 : vector<8x128xf32>
    %11 = tpu.reciprocal %10 {approx = true} : vector<8x128xf32> -> vector<8x128xf32>
    %12 = arith.mulf %10, %11 : vector<8x128xf32>
    %cst_4 = arith.constant 2.000000e+00 : f32
    %13 = vector.broadcast %cst_4 : f32 to vector<8x128xf32>
    %14 = arith.subf %13, %12 : vector<8x128xf32>
    %15 = arith.mulf %11, %14 : vector<8x128xf32>
    %cst_5 = arith.constant 2.000000e+01 : f32
    %16 = vector.broadcast %cst_5 : f32 to vector<8x128xf32>
    %17 = arith.cmpf ogt, %0, %16 : vector<8x128xf32>
    %cst_6 = arith.constant 1.000000e+00 : f32
    %18 = vector.broadcast %cst_6 : f32 to vector<8x128xf32>
    %19 = arith.subf %8, %18 : vector<8x128xf32>
    %20 = arith.mulf %0, %19 : vector<8x128xf32>
    %21 = arith.mulf %20, %15 : vector<8x128xf32>
    %22 = arith.select %17, %0, %21 : vector<8x128xi1>, vector<8x128xf32>
    %c0_7 = arith.constant 0 : index
    %c0_8 = arith.constant 0 : index
    %23 = vector.load %arg3[%c0_7, %c0_8] : memref<128x128xf32, #tpu.memory_space<vmem>>, vector<128x128xf32>
    %cst_9 = arith.constant dense<0.000000e+00> : vector<8x128xf32>
    %24 = tpu.matmul %22, %23, %cst_9 {dimension_numbers = #tpu.dot_dimension_numbers<[1], [0], [0], [1], [0, 0, 1, 1], [], []>} : vector<8x128xf32>, vector<128x128xf32>, vector<8x128xf32> -> vector<8x128xf32>
    %c0_10 = arith.constant 0 : index
    %c0_11 = arith.constant 0 : index
    %25 = vector.load %arg4[%c0_10, %c0_11] : memref<128x128xf32, #tpu.memory_space<vmem>>, vector<128x128xf32>
    %cst_12 = arith.constant dense<0.000000e+00> : vector<8x128xf32>
    %26 = tpu.matmul %22, %25, %cst_12 {dimension_numbers = #tpu.dot_dimension_numbers<[1], [0], [0], [1], [0, 0, 1, 1], [], []>} : vector<8x128xf32>, vector<128x128xf32>, vector<8x128xf32> -> vector<8x128xf32>
    %c0_13 = arith.constant 0 : index
    %c0_14 = arith.constant 0 : index
    %27 = vector.load %arg5[%c0_13, %c0_14] : memref<1x128xf32, #tpu.memory_space<vmem>>, vector<1x128xf32>
    %28 = vector.broadcast %27 : vector<1x128xf32> to vector<8x128xf32>
    %29 = arith.addf %24, %28 : vector<8x128xf32>
    %c0_15 = arith.constant 0 : index
    %c0_16 = arith.constant 0 : index
    %30 = vector.load %arg7[%c0_15, %c0_16] : memref<8x128xf32, #tpu.memory_space<vmem>>, vector<8x128xf32>
    tpu.vector_store %arg7[%c0_15, %c0_16], %29 {strides = array<i32>} : memref<8x128xf32, #tpu.memory_space<vmem>>, vector<8x128xf32>,
    %c0_17 = arith.constant 0 : index
    %c0_18 = arith.constant 0 : index
    %31 = vector.load %arg6[%c0_17, %c0_18] : memref<1x128xf32, #tpu.memory_space<vmem>>, vector<1x128xf32>
    %32 = vector.broadcast %31 : vector<1x128xf32> to vector<8x128xf32>
    %33 = arith.addf %26, %32 : vector<8x128xf32>
    %c0_19 = arith.constant 0 : index
    %c0_20 = arith.constant 0 : index
    %34 = vector.load %arg8[%c0_19, %c0_20] : memref<8x128xf32, #tpu.memory_space<vmem>>, vector<8x128xf32>
    tpu.vector_store %arg8[%c0_19, %c0_20], %33 {strides = array<i32>} : memref<8x128xf32, #tpu.memory_space<vmem>>, vector<8x128xf32>,
    return
  }
  func.func @transform_0(%arg0: i32, %arg1: i32) -> (i32, i32) {
    %c0_i32 = arith.constant 0 : i32
    %c0_i32_0 = arith.constant 0 : i32
    return %arg1, %c0_i32 : i32, i32
  }
  func.func @transform_1(%arg0: i32, %arg1: i32) -> (i32, i32) {
    %c0_i32 = arith.constant 0 : i32
    %c0_i32_0 = arith.constant 0 : i32
    return %c0_i32, %arg0 : i32, i32
  }
  func.func @transform_2(%arg0: i32, %arg1: i32) -> (i32, i32) {
    %c1_i32 = arith.constant 1 : i32
    %0 = arith.addi %arg0, %c1_i32 : i32
    %c0_i32 = arith.constant 0 : i32
    %c0_i32_0 = arith.constant 0 : i32
    return %c0_i32, %0 : i32, i32
  }
  func.func @transform_3(%arg0: i32, %arg1: i32) -> (i32, i32) {
    %c0_i32 = arith.constant 0 : i32
    %c0_i32_0 = arith.constant 0 : i32
    return %c0_i32, %arg0 : i32, i32
  }
  func.func @transform_4(%arg0: i32, %arg1: i32) -> (i32, i32) {
    %c1_i32 = arith.constant 1 : i32
    %0 = arith.addi %arg0, %c1_i32 : i32
    %c0_i32 = arith.constant 0 : i32
    %c0_i32_0 = arith.constant 0 : i32
    return %c0_i32, %0 : i32, i32
  }
  func.func @transform_5(%arg0: i32, %arg1: i32) -> (i32, i32) {
    %c0_i32 = arith.constant 0 : i32
    return %arg1, %arg0 : i32, i32
  }
  func.func @transform_6(%arg0: i32, %arg1: i32) -> (i32, i32) {
    %c0_i32 = arith.constant 0 : i32
    return %arg1, %arg0 : i32, i32
  }
}

</mosaic_0001>

<bundles_post_ra>
// kernel: tpu_custom_call.1
= control target key start
LH: loop header
LB: loop body
LE: loop exit
PB: predicated region body
PF: predicated region fallthrough
CT: control target
= control target key end

     0   :  { %12 = vsyncpa [#allocation3], 0  ;;  %s760_s0 = inlined_call_operand.hbm [shape: f32[8,128], index: 0, kind: input, shape index: {}]   ;;  %s761_s1 = inlined_call_operand.hbm [shape: f32[128,256], index: 1, kind: input, shape index: {}]   ;;  %s762_s2 = inlined_call_operand.hbm [shape: f32[128,256], index: 2, kind: input, shape index: {}]   ;;  %s763_s3 = inlined_call_operand.vmem [shape: f32[1,256], index: 3, kind: input, shape index: {}]   ;;  %s764_s4 = inlined_call_operand.vmem [shape: f32[1,256], index: 4, kind: input, shape index: {}]   ;;  %s765_s5 = inlined_call_operand.hbm [shape: f32[8,128], index: 5, kind: output, shape index: {0}]   ;;  %s766_s6 = inlined_call_operand.hbm [shape: f32[8,128], index: 6, kind: output, shape index: {1}]  }
   0x1   :  { %13 = vsyncpa [#allocation6], 0 }
   0x2   :  { %14 = vsyncpa [#allocation4], 0 }
   0x3   :  { %15 = vsyncpa [#allocation10], 0  ;;  %s611_s21 = smov [#allocation5]   ;;  %s490_s25 = scalar_lea.hbm %s761_s1, 2048 }
   0x4   :  { %s31_s22 = sshll.u32 %s611_s21, 4  ;;  %p491_p0 = scmp.ne.s32.totalorder %s761_s1, %s490_s25  ;;  %s32_s22 = int_to_ptr.vmem [resolvable:$true] %s31_s22 }
   0x5   :  { %s492_s30 = scalar_lea.hbm %s761_s1, 4096  ;;  %p494_p2 = scmp.lt.u32.totalorder %s490_s25, %s761_s1 }
   0x6   :  { %p493_p1 = scmp.lt.u32.totalorder %s492_s30, %s490_s25 }
   0x8   :  { %p495_p3 = por %p494_p2, %p493_p1 }
   0xa   :  { %p496_p4 = pnand %p495_p3, %p491_p0 }
   0xc   :  { %499 = shalt.err (!%p496_p4)
}
   0xd   :  { %s500_s9 = scalar_lea.vmem %s32_s22, 2048  ;;  %p505_p6 = scmp.lt.s32.totalorder %s32_s22, %s32_s22 }
   0xe   :  { %p501_p5 = scmp.ne.s32.totalorder %s32_s22, %s500_s9  ;;  %p506_p7 = scmp.lt.s32.totalorder %s500_s9, %s500_s9 }
  0x10   :  { %p507_p8 = por %p506_p7, %p505_p6 }
  0x12   :  { %p508_p9 = pnand %p507_p8, %p501_p5 }
  0x14   :  { %511 = shalt.err (!%p508_p9)
}
  0x15   :  { %s612_s10 = smov 256   ;;  %s613_s11 = smov 128  }
  0x16   :  { %s614_s12 = smov 8   ;;  %s678_s17 = scalar_lea.hbm %s762_s2, 128 }
  0x17   :  { %37 = dma.hbm_to_vmem [thread:$0]  %s761_s1, 2048, %s32_s22, [#allocation6], %s612_s10, %s613_s11, %s614_s12  }
  0x18   :  { %s615_s18 = smov [#allocation2]   ;;  %s616_s20 = smov [#allocation7]  }
  0x19   :  { %s22_s19 = sshll.u32 %s615_s18, 4  ;;  %s46_s21 = sshll.u32 %s616_s20, 4  ;;  %s23_s19 = int_to_ptr.vmem [resolvable:$true] %s22_s19  ;;  %s47_s21 = int_to_ptr.vmem [resolvable:$true] %s46_s21 }
  0x1a   :  { %s512_s25 = scalar_lea.hbm %s760_s0, 128 }
  0x1b   :  { %p513_p10 = scmp.ne.s32.totalorder %s760_s0, %s512_s25  ;;  %p516_p11 = scmp.lt.u32.totalorder %s512_s25, %s760_s0 }
  0x1d   :  { %p518_p12 = pnand %p516_p11, %p513_p10 }
  0x1f   :  { %521 = shalt.err (!%p518_p12)
}
  0x20   :  { %s522_s22 = scalar_lea.vmem %s23_s19, 128  ;;  %p527_p0 = scmp.lt.s32.totalorder %s23_s19, %s23_s19 }
  0x21   :  { %p523_p13 = scmp.ne.s32.totalorder %s23_s19, %s522_s22  ;;  %p528_p1 = scmp.lt.s32.totalorder %s522_s22, %s522_s22 }
  0x23   :  { %p529_p2 = por %p528_p1, %p527_p0 }
  0x25   :  { %p530_p3 = pnand %p529_p2, %p523_p13 }
  0x27   :  { %533 = shalt.err (!%p530_p3)
}
  0x28   :  { %25 = dma.hbm_to_vmem [thread:$0]  %s760_s0, 128, %s23_s19, [#allocation3]  }
  0x29   :  { %s558_s9 = scalar_lea.hbm %s762_s2, 2176  ;;  %s536_s15 = scalar_lea.hbm %s762_s2, 4096 }
  0x2a   :  { %p535_p4 = scmp.ne.s32.totalorder %s678_s17, %s558_s9  ;;  %p537_p5 = scmp.lt.u32.totalorder %s678_s17, %s762_s2 }
  0x2b   :  { %p538_p6 = scmp.lt.u32.totalorder %s536_s15, %s558_s9  ;;  %p540_p8 = scmp.lt.u32.totalorder %s558_s9, %s678_s17 }
  0x2d   :  { %p539_p7 = por %p538_p6, %p537_p5 }
  0x2f   :  { %p541_p9 = por %p540_p8, %p539_p7 }
  0x31   :  { %p542_p10 = pnand %p541_p9, %p535_p4 }
  0x33   :  { %545 = shalt.err (!%p542_p10)
}
  0x34   :  { %s546_s0 = scalar_lea.vmem %s47_s21, 2048  ;;  %p551_p12 = scmp.lt.s32.totalorder %s47_s21, %s47_s21 }
  0x35   :  { %p547_p11 = scmp.ne.s32.totalorder %s47_s21, %s546_s0  ;;  %p552_p13 = scmp.lt.s32.totalorder %s546_s0, %s546_s0 }
  0x37   :  { %p553_p0 = por %p552_p13, %p551_p12 }
  0x39   :  { %p554_p1 = pnand %p553_p0, %p547_p11 }
  0x3b   :  { %557 = shalt.err (!%p554_p1)
}
  0x3c   :  { %52 = dma.hbm_to_vmem [thread:$0]  %s678_s17, 2048, %s47_s21, [#allocation6], %s612_s10, %s613_s11, %s614_s12  }
  0x3d   :  { %603 = dma.done.wait [#allocation3], 128  }
  0x3e   :  { %604 = vsyncadd [#allocation3], 4294967168 }
  0x3f   :  { %605 = dma.done.wait [#allocation6], 4096  }
  0x40   :  { %606 = vsyncadd [#allocation6], 4294963200  ;;  %v617_v0 = vmov 0.0|0.0   ;;  %vm618_vm0 = vmmov 0   ;;  %v619_v1 = vmov 0.0   ;;  %v97_v2 = vld [vmem:[#allocation5] sm:$0xff] }
  0x41   :  { %427 = vmatprep.subr.bf16.mxu0 %v617_v0  ;;  %451 = vmatprep.subr.bf16.mxu1 %v617_v0  ;;  %v98_v3 = vld [vmem:[#allocation5 + $0x8] sm:$0xff]  ;;  %v113_v4 = vld [vmem:[#allocation7] sm:$0xff]  ;;  %v99_v7 = vld [vmem:[#allocation5 + $0x10] sm:$0xff]  ;;  %s620_s17 = smov [#allocation8]   ;;  %s621_s20 = smov [#allocation9]  }
  0x42   :  { %389 = vmatprep.mubr.msk.f32.mxu0 %vm618_vm0, %v619_v1  ;;  %424 = vmatprep.mubr.msk.f32.mxu1 %vm618_vm0, %v619_v1  ;;  %v428_v5 = vpack.c.bf16 %v98_v3, %v97_v2  ;;  %v114_v6 = vld [vmem:[#allocation7 + $0x8] sm:$0xff]  ;;  %v100_v8 = vld [vmem:[#allocation5 + $0x18] sm:$0xff]  ;;  %v115_v10 = vld [vmem:[#allocation7 + $0x10] sm:$0xff]  ;;  %s291_s19 = sshll.u32 %s620_s17, 4  ;;  %s301_s21 = sshll.u32 %s621_s20, 4  ;;  %s292_s19 = int_to_ptr.vmem [resolvable:$true] %s291_s19  ;;  %s302_s21 = int_to_ptr.vmem [resolvable:$true] %s301_s21 }
  0x43   :  { %v452_v9 = vpack.c.bf16 %v114_v6, %v113_v4  ;;  %v116_v11 = vld [vmem:[#allocation7 + $0x18] sm:$0xff]  ;;  %v431_v12 = vpack.c.bf16 %v100_v8, %v99_v7  ;;  %v101_v14 = vld [vmem:[#allocation5 + $0x20] sm:$0xff]  ;;  %v102_v15 = vld [vmem:[#allocation5 + $0x28] sm:$0xff]  ;;  %s559_s23 = scalar_lea.vmem %s292_s19, 128  ;;  %p564_p3 = scmp.lt.s32.totalorder %s292_s19, %s292_s19 }
  0x44   :  { %429 = vmatpush3.bf16.msra.mxu0 %v428_v5  ;;  %v455_v13 = vpack.c.bf16 %v116_v11, %v115_v10  ;;  %v117_v16 = vld [vmem:[#allocation7 + $0x20] sm:$0xff]  ;;  %v118_v17 = vld [vmem:[#allocation7 + $0x28] sm:$0xff]  ;;  %v434_v18 = vpack.c.bf16 %v102_v15, %v101_v14  ;;  %v103_v20 = vld [vmem:[#allocation5 + $0x30] sm:$0xff]  ;;  %p560_p2 = scmp.ne.s32.totalorder %s292_s19, %s559_s23  ;;  %p565_p4 = scmp.lt.s32.totalorder %s559_s23, %s559_s23 }
  0x45   :  { %453 = vmatpush3.bf16.msra.mxu1 %v452_v9  ;;  %430 = vmatprep.subr.bf16.mxu0 %v617_v0  ;;  %v458_v19 = vpack.c.bf16 %v118_v17, %v117_v16  ;;  %v104_v21 = vld [vmem:[#allocation5 + $0x38] sm:$0xff]  ;;  %v119_v22 = vld [vmem:[#allocation7 + $0x30] sm:$0xff]  ;;  %v105_v28 = vld [vmem:[#allocation5 + $0x40] sm:$0xff] }
  0x46   :  { %454 = vmatprep.subr.bf16.mxu1 %v617_v0  ;;  %v120_v23 = vld [vmem:[#allocation7 + $0x38] sm:$0xff]  ;;  %v437_v25 = vpack.c.bf16 %v104_v21, %v103_v20  ;;  %v106_v29 = vld [vmem:[#allocation5 + $0x48] sm:$0xff]  ;;  %v121_v30 = vld [vmem:[#allocation7 + $0x40] sm:$0xff]  ;;  %p566_p5 = por %p565_p4, %p564_p3 }
  0x47   :  { %v714_v24 = vld [vmem:[#allocation2] sm:$0xff]  ;;  %v461_v27 = vpack.c.bf16 %v120_v23, %v119_v22  ;;  %v122_v31 = vld [vmem:[#allocation7 + $0x48] sm:$0xff]  ;;  %v440_v33 = vpack.c.bf16 %v106_v29, %v105_v28  ;;  %v107_v35 = vld [vmem:[#allocation5 + $0x50] sm:$0xff] }
  0x48   :  { %432 = vmatpush3.bf16.msra.mxu0 %v431_v12  ;;  %v82_v26 = vmin.f32 %v714_v24, 20.0  ;;  %v464_v34 = vpack.c.bf16 %v122_v31, %v121_v30  ;;  %v108_v36 = vld [vmem:[#allocation5 + $0x58] sm:$0xff]  ;;  %v123_v37 = vld [vmem:[#allocation7 + $0x50] sm:$0xff]  ;;  %v109_v41 = vld [vmem:[#allocation5 + $0x60] sm:$0xff]  ;;  %vm92_vm1 = vcmp.gt.f32.partialorder %v714_v24, 20.0  ;;  %p567_p6 = pnand %p566_p5, %p560_p2 }
  0x49   :  { %456 = vmatpush3.bf16.msra.mxu1 %v455_v13  ;;  %433 = vmatprep.subr.bf16.mxu0 %v617_v0  ;;  %v124_v38 = vld [vmem:[#allocation7 + $0x58] sm:$0xff]  ;;  %v443_v39 = vpack.c.bf16 %v108_v36, %v107_v35  ;;  %v110_v42 = vld [vmem:[#allocation5 + $0x68] sm:$0xff]  ;;  %v125_v43 = vld [vmem:[#allocation7 + $0x60] sm:$0xff] }
  0x4a   :  { %457 = vmatprep.subr.bf16.mxu1 %v617_v0  ;;  %v83_v32 = vmul.f32 1.442695, %v82_v26  ;;  %v467_v40 = vpack.c.bf16 %v124_v38, %v123_v37  ;;  %v126_v44 = vld [vmem:[#allocation7 + $0x68] sm:$0xff]  ;;  %v446_v45 = vpack.c.bf16 %v110_v42, %v109_v41  ;;  %v111_v47 = vld [vmem:[#allocation5 + $0x70] sm:$0xff]  ;;  %v112_v48 = vld [vmem:[#allocation5 + $0x78] sm:$0xff] }
  0x4b   :  { %v470_v46 = vpack.c.bf16 %v126_v44, %v125_v43  ;;  %v127_v50 = vld [vmem:[#allocation7 + $0x70] sm:$0xff]  ;;  %v128_v51 = vld [vmem:[#allocation7 + $0x78] sm:$0xff]  ;;  %v449_v53 = vpack.c.bf16 %v112_v48, %v111_v47 }
  0x4c   :  { %435 = vmatpush3.bf16.msra.mxu0 %v434_v18  ;;  %486 = vpow2.f32 %v83_v32  ;;  %v473_v54 = vpack.c.bf16 %v128_v51, %v127_v50  ;;  %v322_v2 = vld [vmem:[%s764_s4 + $0x1] ss:$0 sm:$0xff] }
  0x4d   :  { %459 = vmatpush3.bf16.msra.mxu1 %v458_v19  ;;  %436 = vmatprep.subr.bf16.mxu0 %v617_v0 }
  0x4e   :  { %460 = vmatprep.subr.bf16.mxu1 %v617_v0 }
  0x50   :  { %438 = vmatpush3.bf16.msra.mxu0 %v437_v25 }
  0x51   :  { %462 = vmatpush3.bf16.msra.mxu1 %v461_v27  ;;  %439 = vmatprep.subr.bf16.mxu0 %v617_v0 }
  0x52   :  { %463 = vmatprep.subr.bf16.mxu1 %v617_v0 }
  0x54   :  { %441 = vmatpush3.bf16.msra.mxu0 %v440_v33 }
  0x55   :  { %465 = vmatpush3.bf16.msra.mxu1 %v464_v34  ;;  %442 = vmatprep.subr.bf16.mxu0 %v617_v0 }
  0x56   :  { %466 = vmatprep.subr.bf16.mxu1 %v617_v0  ;;  %v487_v49 = vpop.eup %486 }
  0x57   :  { %v85_v52 = vadd.f32 1.0, %v487_v49 }
  0x58   :  { %444 = vmatpush3.bf16.msra.mxu0 %v443_v39 }
  0x59   :  { %468 = vmatpush3.bf16.msra.mxu1 %v467_v40  ;;  %445 = vmatprep.subr.bf16.mxu0 %v617_v0  ;;  %v86_v55 = vmul.f32 %v85_v52, %v85_v52 }
  0x5a   :  { %469 = vmatprep.subr.bf16.mxu1 %v617_v0 }
  0x5b   :  { %v87_v56 = vadd.f32 1.0, %v86_v55  ;;  %v319_v57 = vadd.f32 -1.0, %v86_v55 }
  0x5c   :  { %447 = vmatpush3.bf16.msra.mxu0 %v446_v45 }
  0x5d   :  { %471 = vmatpush3.bf16.msra.mxu1 %v470_v46  ;;  %448 = vmatprep.subr.bf16.mxu0 %v617_v0  ;;  %488 = vrcp.f32 %v87_v56  ;;  %v94_v61 = vmul.f32 %v319_v57, %v714_v24 }
  0x5e   :  { %472 = vmatprep.subr.bf16.mxu1 %v617_v0  ;;  %v320_v0 = vld [vmem:[%s763_s3] ss:$0 sm:$0xff] }
  0x60   :  { %450 = vmatpush3.bf16.msra.mxu0 %v449_v53 }
  0x61   :  { %474 = vmatpush3.bf16.msra.mxu1 %v473_v54 }
  0x67   :  { %v489_v58 = vpop.eup %488 }
  0x68   :  { %v89_v59 = vmul.f32 %v489_v58, %v87_v56 }
  0x6a   :  { %v90_v60 = vsub.f32 2.0, %v89_v59 }
  0x6c   :  { %v91_v62 = vmul.f32 %v489_v58, %v90_v60 }
  0x6e   :  { %v95_v63 = vmul.f32 %v94_v61, %v91_v62 }
  0x70   :  { %v96_v1 = vsel %vm92_vm1, %v714_v24, %v95_v63 }
  0x71   :  { %390 = vmatmul.mubr.f32.vlgmr.msra.gmra.mrb[0].mxu0 %v96_v1  ;;  %425 = vmatmul.mubr.f32.vlgmr.msra.gmra.mrb[0].mxu1 %v96_v1 }
 0x144   :  { %v202_v3 = vpop.f32.mrb[0].mxu0  ;;  %v280_v4 = vpop.f32.mrb[0].mxu1 }
 0x145   :  { %v203_v5 = vadd.f32 %v320_v0, %v202_v3  ;;  %v281_v6 = vadd.f32 %v322_v2, %v280_v4  ;;  %v391_v7 = vpop.f32.mrb[1].mxu0  ;;  %v426_v8 = vpop.f32.mrb[1].mxu1 }
 0x147   :  { %206 = vst [vmem:[#allocation8] sm:$0xff] %v203_v5  ;;  %284 = vst [vmem:[#allocation9] sm:$0xff] %v281_v6 }
 0x148   :  { %570 = shalt.err (!%p567_p6)
}
 0x149   :  { %s571_s24 = scalar_lea.hbm %s765_s5, 128 }
 0x14a   :  { %p572_p7 = scmp.ne.s32.totalorder %s765_s5, %s571_s24  ;;  %p575_p8 = scmp.lt.u32.totalorder %s571_s24, %s765_s5 }
 0x14c   :  { %p577_p9 = pnand %p575_p8, %p572_p7 }
 0x14e   :  { %580 = shalt.err (!%p577_p9)
}
 0x14f   :  { %294 = dma.vmem_to_hbm [thread:$0]  %s292_s19, 128, %s765_s5, [#allocation4]  }
 0x150   :  { %s581_s29 = scalar_lea.vmem %s302_s21, 128  ;;  %p586_p11 = scmp.lt.s32.totalorder %s302_s21, %s302_s21 }
 0x151   :  { %p582_p10 = scmp.ne.s32.totalorder %s302_s21, %s581_s29  ;;  %p587_p12 = scmp.lt.s32.totalorder %s581_s29, %s581_s29 }
 0x153   :  { %p588_p13 = por %p587_p12, %p586_p11 }
 0x155   :  { %p589_p0 = pnand %p588_p13, %p582_p10 }
 0x157   :  { %592 = shalt.err (!%p589_p0)
}
 0x158   :  { %s593_s8 = scalar_lea.hbm %s766_s6, 128 }
 0x159   :  { %p594_p1 = scmp.ne.s32.totalorder %s766_s6, %s593_s8  ;;  %p597_p2 = scmp.lt.u32.totalorder %s593_s8, %s766_s6 }
 0x15b   :  { %p599_p3 = pnand %p597_p2, %p594_p1 }
 0x15d   :  { %602 = shalt.err (!%p599_p3)
}
 0x15e   :  { %304 = dma.vmem_to_hbm [thread:$0]  %s302_s21, 128, %s766_s6, [#allocation10]  }
 0x15f   :  { %607 = dma.done.wait [#allocation4], 128  }
 0x160   :  { %608 = vsyncadd [#allocation4], 4294967168 }
 0x161   :  { %609 = dma.done.wait [#allocation10], 128  }
 0x162   :  { %610 = vsyncadd [#allocation10], 4294967168 }
 0x163   :  { %311 = vsyncpa [#allocation3], 1 }
 0x164   :  { %312 = vsyncpa [#allocation6], 1 }
 0x165   :  { %313 = vsyncpa [#allocation4], 1 }
 0x166   :  { %314 = vsyncpa [#allocation10], 1 }

</bundles_post_ra>
